<compile_context>
chip_gen: v7x
topology: tpu7x:2x2x1
jax: 0.10.0
libtpu: 0.0.40
codegen_flags: <defaults>
</compile_context>

<pallas_src>
import functools

import jax
import jax.numpy as jnp
import numpy as np
from jax.experimental import pallas as pl
from jax.experimental.pallas import tpu as pltpu


def dd_kernel(x_ref, m_ref, w1_ref, w2_ref, out_ref, *, W, L):
    """One grid step (B_blk images fused on the lane axis).

    x_ref  : (1, C, L)       input, L = B_blk * P_pad pixels on lanes
    m_ref  : (9, L)          f32 {0,1} boundary masks, one row per tap
    w1_ref : (C, 9*C + 1)    conv1 weights (BN folded), last column = bias
    w2_ref : (3, 9*C + 1)    conv_out weights, last column = bias
    out_ref: (1, 3, L)
    """
    x = x_ref[0]                                  # (C, L) float32
    C = x.shape[0]
    m = m_ref[...]                                # (9, L)

    # Tap order matches the wrapper's weight flattening: t = (dy+1)*3 + (dx+1).
    offsets = [dy * W + dx for dy in (-1, 0, 1) for dx in (-1, 0, 1)]
    ones_row = jnp.ones((1, L), jnp.float32)      # folds the bias into the matmul

    def stacked_taps(inp):
        # inp: (C, L)  ->  (9*C + 1, L): 9 shifted taps stacked on sublanes + ones.
        rows = []
        for t, d in enumerate(offsets):
            xs = inp if d == 0 else pltpu.roll(inp, (-d) % L, 1)   # xs[q] = inp[q+d]
            if t != 4:                            # center tap: mask is all-true, skip
                xs = xs * m[t]
            rows.append(xs)
        rows.append(ones_row)
        return jnp.concatenate(rows, axis=0)

    # conv1 (BN folded into weights + bias column) + ReLU + residual
    h = jnp.dot(w1_ref[...], stacked_taps(x), preferred_element_type=jnp.float32)
    z = jnp.maximum(h, 0.0) + x
    # conv_out (bias folded into last column)
    out_ref[0] = jnp.dot(w2_ref[...], stacked_taps(z),
                         preferred_element_type=jnp.float32)


def dd_forward(x, params):
    """x: (N, C, H, W) float32 (PyTorch NCHW). Returns (N, 3, H, W)."""
    w1, gamma, beta, mean, var, w2, b2 = params
    N, C, H, W = x.shape
    P = H * W
    P_pad = max(128, ((P + 127) // 128) * 128)    # lane-dense pixel axis
    eps = 1e-5

    # ---- Fold BatchNorm (inference form) into conv1: y = scale*conv(x) + shift ----
    scale = gamma / jnp.sqrt(var + eps)
    b1 = beta - mean * scale
    w1_eff = w1 * scale[:, None, None, None]      # (C, C, 3, 3)

    # ---- Flatten 3x3 weights to (Cout, 9*Cin) with column index t*Cin + cin,
    #      t = kh*3 + kw, and append the bias as the last column. ----
    def stack_weight(w, b):
        co, ci = w.shape[0], w.shape[1]
        wf = jnp.transpose(w, (0, 2, 3, 1)).reshape(co, 9 * ci)
        return jnp.concatenate([wf, b.reshape(co, 1)], axis=1)     # (co, 9*ci + 1)

    w1s = stack_weight(w1_eff, b1)                # (C, 9C+1)
    w2s = stack_weight(w2, b2)                    # (3, 9C+1)

    # ---- Grid / batch-fusion choice: keep 2 parallel steps when possible so
    #      v7x megacore can shard the batch; otherwise fuse everything. ----
    n_steps = 2 if (N >= 2 and N % 2 == 0) else 1
    B_blk = N // n_steps
    L = B_blk * P_pad

    # ---- Boundary-mask table (9, L): periodic per image, multiply not select ----
    p_idx = jnp.arange(P_pad)
    row, col = p_idx // W, p_idx % W
    valid_c = p_idx < P                           # padded tail (if any) contributes 0
    mrows = []
    for dy in (-1, 0, 1):
        for dx in (-1, 0, 1):
            mrows.append(valid_c & (row + dy >= 0) & (row + dy < H)
                         & (col + dx >= 0) & (col + dx < W))
    mask = jnp.tile(jnp.stack(mrows).astype(jnp.float32), (1, B_blk))  # (9, L)

    # ---- Data layout: (n_steps, C, B_blk*P_pad), pixels (+ fused images) on lanes.
    #      For B_blk == 1 this is a pure reshape (no HBM transpose pass). ----
    xf = x.reshape(N, C, P)
    if P_pad != P:
        xf = jnp.pad(xf, ((0, 0), (0, 0), (0, P_pad - P)))
    xf = (xf.reshape(n_steps, B_blk, C, P_pad)
            .transpose(0, 2, 1, 3)
            .reshape(n_steps, C, L))

    kernel = functools.partial(dd_kernel, W=W, L=L)

    out = pl.pallas_call(
        kernel,
        out_shape=jax.ShapeDtypeStruct((n_steps, 3, L), jnp.float32),
        grid_spec=pltpu.PrefetchScalarGridSpec(
            num_scalar_prefetch=0,
            grid=(n_steps,),
            in_specs=[
                pl.BlockSpec((1, C, L), lambda s: (s, 0, 0)),
                pl.BlockSpec((9, L), lambda s: (0, 0)),
                pl.BlockSpec((C, 9 * C + 1), lambda s: (0, 0)),
                pl.BlockSpec((3, 9 * C + 1), lambda s: (0, 0)),
            ],
            out_specs=pl.BlockSpec((1, 3, L), lambda s: (s, 0, 0)),
        ),
        compiler_params=pltpu.CompilerParams(dimension_semantics=("parallel",)),
    )(xf, mask, w1s, w2s)

    out = (out.reshape(n_steps, 3, B_blk, P_pad)
              .transpose(0, 2, 1, 3)
              .reshape(N, 3, P_pad))
    return out[:, :, :P].reshape(N, 3, H, W)


def dd_reference(x, params):
    """Pure-JAX reference mirroring the PyTorch forward (inference-mode BN)."""
    w1, gamma, beta, mean, var, w2, b2 = params
    eps = 1e-5

    def conv3x3(inp, w):
        return jax.lax.conv_general_dilated(
            inp, w, window_strides=(1, 1), padding=((1, 1), (1, 1)),
            dimension_numbers=('NCHW', 'OIHW', 'NCHW'))

    y = conv3x3(x, w1)
    y = (y - mean.reshape(1, -1, 1, 1)) / jnp.sqrt(var.reshape(1, -1, 1, 1) + eps)
    y = y * gamma.reshape(1, -1, 1, 1) + beta.reshape(1, -1, 1, 1)
    y = jnp.maximum(y, 0.0) + x
    out = conv3x3(y, w2) + b2.reshape(1, -1, 1, 1)
    return out


if __name__ == "__main__":
    channel = 4
    N, H, W = 2, 16, 16

    key = jax.random.PRNGKey(0)
    ks = jax.random.split(key, 8)

    x = jax.random.normal(ks[0], (N, channel, H, W), jnp.float32)

    # Deterministic synthetic parameters (PyTorch layouts).
    w1 = 0.1 * jax.random.normal(ks[1], (channel, channel, 3, 3), jnp.float32)
    gamma = 1.0 + 0.1 * jax.random.normal(ks[2], (channel,), jnp.float32)
    beta = 0.1 * jax.random.normal(ks[3], (channel,), jnp.float32)
    mean = 0.1 * jax.random.normal(ks[4], (channel,), jnp.float32)
    var = 1.0 + 0.5 * jnp.abs(jax.random.normal(ks[5], (channel,), jnp.float32))
    w2 = 0.1 * jax.random.normal(ks[6], (3, channel, 3, 3), jnp.float32)
    b2 = 0.1 * jax.random.normal(ks[7], (3,), jnp.float32)

    params = (w1, gamma, beta, mean, var, w2, b2)

    out = jax.block_until_ready(dd_forward(x, params))
    ref = dd_reference(x, params)

    assert out.shape == (N, 3, H, W)
    np.testing.assert_allclose(np.asarray(out), np.asarray(ref), rtol=1e-4, atol=1e-4)
    print("KERNEL_OK")
</pallas_src>

<mosaic_0001>
module attributes {stable_mosaic.version = 11 : i64} {
  func.func @dd_kernel(%arg0: i32, %arg1: memref<1x4x256xf32, #tpu.memory_space<vmem>>, %arg2: memref<9x256xf32, #tpu.memory_space<vmem>>, %arg3: memref<4x37xf32, #tpu.memory_space<vmem>>, %arg4: memref<3x37xf32, #tpu.memory_space<vmem>>, %arg5: memref<1x3x256xf32, #tpu.memory_space<vmem>>) attributes {dimension_semantics = [#tpu.dimension_semantics<parallel>], iteration_bounds = array<i64: 2>, scalar_prefetch = 0 : i64, scratch_operands = 0 : i64, tpu.core_type = #tpu.core_type<tc>, window_params = [{transform_indices = @transform_0, window_bounds = array<i64: 1, 4, 256>}, {pipeline_mode = #tpu.pipeline_mode<synchronous>, transform_indices = @transform_1, window_bounds = array<i64: 9, 256>}, {pipeline_mode = #tpu.pipeline_mode<synchronous>, transform_indices = @transform_2, window_bounds = array<i64: 4, 37>}, {pipeline_mode = #tpu.pipeline_mode<synchronous>, transform_indices = @transform_3, window_bounds = array<i64: 3, 37>}, {transform_indices = @transform_4, window_bounds = array<i64: 1, 3, 256>}]} {
    %c0 = arith.constant 0 : index
    %c0_0 = arith.constant 0 : index
    %c0_1 = arith.constant 0 : index
    %0 = vector.load %arg1[%c0, %c0_0, %c0_1] : memref<1x4x256xf32, #tpu.memory_space<vmem>>, vector<1x4x256xf32>
    %1 = vector.shape_cast %0 : vector<1x4x256xf32> to vector<4x256xf32>
    %c0_2 = arith.constant 0 : index
    %c0_3 = arith.constant 0 : index
    %2 = vector.load %arg2[%c0_2, %c0_3] : memref<9x256xf32, #tpu.memory_space<vmem>>, vector<9x256xf32>
    %cst = arith.constant 1.000000e+00 : f32
    %3 = vector.broadcast %cst : f32 to vector<1x256xf32>
    %c0_4 = arith.constant 0 : index
    %c0_5 = arith.constant 0 : index
    %4 = vector.load %arg3[%c0_4, %c0_5] : memref<4x37xf32, #tpu.memory_space<vmem>>, vector<4x37xf32>
    %c17_i32 = arith.constant 17 : i32
    %5 = tpu.dynamic_rotate %1 by %c17_i32 dim 1 : vector<4x256xf32>, i32 -> vector<4x256xf32>
    %6 = vector.extract_strided_slice %2 {offsets = [0, 0], sizes = [1, 256], strides = [1, 1]} : vector<9x256xf32> to vector<1x256xf32>
    %7 = vector.shape_cast %6 : vector<1x256xf32> to vector<256xf32>
    %8 = vector.shape_cast %7 : vector<256xf32> to vector<1x256xf32>
    %9 = vector.broadcast %8 : vector<1x256xf32> to vector<4x256xf32>
    %10 = arith.mulf %5, %9 : vector<4x256xf32>
    %c16_i32 = arith.constant 16 : i32
    %11 = tpu.dynamic_rotate %1 by %c16_i32 dim 1 : vector<4x256xf32>, i32 -> vector<4x256xf32>
    %12 = vector.extract_strided_slice %2 {offsets = [1, 0], sizes = [1, 256], strides = [1, 1]} : vector<9x256xf32> to vector<1x256xf32>
    %13 = vector.shape_cast %12 : vector<1x256xf32> to vector<256xf32>
    %14 = vector.shape_cast %13 : vector<256xf32> to vector<1x256xf32>
    %15 = vector.broadcast %14 : vector<1x256xf32> to vector<4x256xf32>
    %16 = arith.mulf %11, %15 : vector<4x256xf32>
    %c15_i32 = arith.constant 15 : i32
    %17 = tpu.dynamic_rotate %1 by %c15_i32 dim 1 : vector<4x256xf32>, i32 -> vector<4x256xf32>
    %18 = vector.extract_strided_slice %2 {offsets = [2, 0], sizes = [1, 256], strides = [1, 1]} : vector<9x256xf32> to vector<1x256xf32>
    %19 = vector.shape_cast %18 : vector<1x256xf32> to vector<256xf32>
    %20 = vector.shape_cast %19 : vector<256xf32> to vector<1x256xf32>
    %21 = vector.broadcast %20 : vector<1x256xf32> to vector<4x256xf32>
    %22 = arith.mulf %17, %21 : vector<4x256xf32>
    %c1_i32 = arith.constant 1 : i32
    %23 = tpu.dynamic_rotate %1 by %c1_i32 dim 1 : vector<4x256xf32>, i32 -> vector<4x256xf32>
    %24 = vector.extract_strided_slice %2 {offsets = [3, 0], sizes = [1, 256], strides = [1, 1]} : vector<9x256xf32> to vector<1x256xf32>
    %25 = vector.shape_cast %24 : vector<1x256xf32> to vector<256xf32>
    %26 = vector.shape_cast %25 : vector<256xf32> to vector<1x256xf32>
    %27 = vector.broadcast %26 : vector<1x256xf32> to vector<4x256xf32>
    %28 = arith.mulf %23, %27 : vector<4x256xf32>
    %c255_i32 = arith.constant 255 : i32
    %29 = tpu.dynamic_rotate %1 by %c255_i32 dim 1 : vector<4x256xf32>, i32 -> vector<4x256xf32>
    %30 = vector.extract_strided_slice %2 {offsets = [5, 0], sizes = [1, 256], strides = [1, 1]} : vector<9x256xf32> to vector<1x256xf32>
    %31 = vector.shape_cast %30 : vector<1x256xf32> to vector<256xf32>
    %32 = vector.shape_cast %31 : vector<256xf32> to vector<1x256xf32>
    %33 = vector.broadcast %32 : vector<1x256xf32> to vector<4x256xf32>
    %34 = arith.mulf %29, %33 : vector<4x256xf32>
    %c241_i32 = arith.constant 241 : i32
    %35 = tpu.dynamic_rotate %1 by %c241_i32 dim 1 : vector<4x256xf32>, i32 -> vector<4x256xf32>
    %36 = vector.extract_strided_slice %2 {offsets = [6, 0], sizes = [1, 256], strides = [1, 1]} : vector<9x256xf32> to vector<1x256xf32>
    %37 = vector.shape_cast %36 : vector<1x256xf32> to vector<256xf32>
    %38 = vector.shape_cast %37 : vector<256xf32> to vector<1x256xf32>
    %39 = vector.broadcast %38 : vector<1x256xf32> to vector<4x256xf32>
    %40 = arith.mulf %35, %39 : vector<4x256xf32>
    %c240_i32 = arith.constant 240 : i32
    %41 = tpu.dynamic_rotate %1 by %c240_i32 dim 1 : vector<4x256xf32>, i32 -> vector<4x256xf32>
    %42 = vector.extract_strided_slice %2 {offsets = [7, 0], sizes = [1, 256], strides = [1, 1]} : vector<9x256xf32> to vector<1x256xf32>
    %43 = vector.shape_cast %42 : vector<1x256xf32> to vector<256xf32>
    %44 = vector.shape_cast %43 : vector<256xf32> to vector<1x256xf32>
    %45 = vector.broadcast %44 : vector<1x256xf32> to vector<4x256xf32>
    %46 = arith.mulf %41, %45 : vector<4x256xf32>
    %c239_i32 = arith.constant 239 : i32
    %47 = tpu.dynamic_rotate %1 by %c239_i32 dim 1 : vector<4x256xf32>, i32 -> vector<4x256xf32>
    %48 = vector.extract_strided_slice %2 {offsets = [8, 0], sizes = [1, 256], strides = [1, 1]} : vector<9x256xf32> to vector<1x256xf32>
    %49 = vector.shape_cast %48 : vector<1x256xf32> to vector<256xf32>
    %50 = vector.shape_cast %49 : vector<256xf32> to vector<1x256xf32>
    %51 = vector.broadcast %50 : vector<1x256xf32> to vector<4x256xf32>
    %52 = arith.mulf %47, %51 : vector<4x256xf32>
    %53 = tpu.concatenate %10, %16, %22, %28, %1, %34, %40, %46, %52, %3 in 0 : vector<4x256xf32>, vector<4x256xf32>, vector<4x256xf32>, vector<4x256xf32>, vector<4x256xf32>, vector<4x256xf32>, vector<4x256xf32>, vector<4x256xf32>, vector<4x256xf32>, vector<1x256xf32> -> vector<37x256xf32>
    %cst_6 = arith.constant dense<0.000000e+00> : vector<4x256xf32>
    %54 = tpu.matmul %4, %53, %cst_6 {dimension_numbers = #tpu.dot_dimension_numbers<[1], [0], [0], [1], [0, 0, 1, 1], [], []>} : vector<4x37xf32>, vector<37x256xf32>, vector<4x256xf32> -> vector<4x256xf32>
    %cst_7 = arith.constant 0.000000e+00 : f32
    %55 = vector.broadcast %cst_7 : f32 to vector<4x256xf32>
    %56 = arith.maximumf %54, %55 : vector<4x256xf32>
    %57 = arith.addf %56, %1 : vector<4x256xf32>
    %c0_8 = arith.constant 0 : index
    %c0_9 = arith.constant 0 : index
    %58 = vector.load %arg4[%c0_8, %c0_9] : memref<3x37xf32, #tpu.memory_space<vmem>>, vector<3x37xf32>
    %c17_i32_10 = arith.constant 17 : i32
    %59 = tpu.dynamic_rotate %57 by %c17_i32_10 dim 1 : vector<4x256xf32>, i32 -> vector<4x256xf32>
    %60 = vector.extract_strided_slice %2 {offsets = [0, 0], sizes = [1, 256], strides = [1, 1]} : vector<9x256xf32> to vector<1x256xf32>
    %61 = vector.shape_cast %60 : vector<1x256xf32> to vector<256xf32>
    %62 = vector.shape_cast %61 : vector<256xf32> to vector<1x256xf32>
    %63 = vector.broadcast %62 : vector<1x256xf32> to vector<4x256xf32>
    %64 = arith.mulf %59, %63 : vector<4x256xf32>
    %c16_i32_11 = arith.constant 16 : i32
    %65 = tpu.dynamic_rotate %57 by %c16_i32_11 dim 1 : vector<4x256xf32>, i32 -> vector<4x256xf32>
    %66 = vector.extract_strided_slice %2 {offsets = [1, 0], sizes = [1, 256], strides = [1, 1]} : vector<9x256xf32> to vector<1x256xf32>
    %67 = vector.shape_cast %66 : vector<1x256xf32> to vector<256xf32>
    %68 = vector.shape_cast %67 : vector<256xf32> to vector<1x256xf32>
    %69 = vector.broadcast %68 : vector<1x256xf32> to vector<4x256xf32>
    %70 = arith.mulf %65, %69 : vector<4x256xf32>
    %c15_i32_12 = arith.constant 15 : i32
    %71 = tpu.dynamic_rotate %57 by %c15_i32_12 dim 1 : vector<4x256xf32>, i32 -> vector<4x256xf32>
    %72 = vector.extract_strided_slice %2 {offsets = [2, 0], sizes = [1, 256], strides = [1, 1]} : vector<9x256xf32> to vector<1x256xf32>
    %73 = vector.shape_cast %72 : vector<1x256xf32> to vector<256xf32>
    %74 = vector.shape_cast %73 : vector<256xf32> to vector<1x256xf32>
    %75 = vector.broadcast %74 : vector<1x256xf32> to vector<4x256xf32>
    %76 = arith.mulf %71, %75 : vector<4x256xf32>
    %c1_i32_13 = arith.constant 1 : i32
    %77 = tpu.dynamic_rotate %57 by %c1_i32_13 dim 1 : vector<4x256xf32>, i32 -> vector<4x256xf32>
    %78 = vector.extract_strided_slice %2 {offsets = [3, 0], sizes = [1, 256], strides = [1, 1]} : vector<9x256xf32> to vector<1x256xf32>
    %79 = vector.shape_cast %78 : vector<1x256xf32> to vector<256xf32>
    %80 = vector.shape_cast %79 : vector<256xf32> to vector<1x256xf32>
    %81 = vector.broadcast %80 : vector<1x256xf32> to vector<4x256xf32>
    %82 = arith.mulf %77, %81 : vector<4x256xf32>
    %c255_i32_14 = arith.constant 255 : i32
    %83 = tpu.dynamic_rotate %57 by %c255_i32_14 dim 1 : vector<4x256xf32>, i32 -> vector<4x256xf32>
    %84 = vector.extract_strided_slice %2 {offsets = [5, 0], sizes = [1, 256], strides = [1, 1]} : vector<9x256xf32> to vector<1x256xf32>
    %85 = vector.shape_cast %84 : vector<1x256xf32> to vector<256xf32>
    %86 = vector.shape_cast %85 : vector<256xf32> to vector<1x256xf32>
    %87 = vector.broadcast %86 : vector<1x256xf32> to vector<4x256xf32>
    %88 = arith.mulf %83, %87 : vector<4x256xf32>
    %c241_i32_15 = arith.constant 241 : i32
    %89 = tpu.dynamic_rotate %57 by %c241_i32_15 dim 1 : vector<4x256xf32>, i32 -> vector<4x256xf32>
    %90 = vector.extract_strided_slice %2 {offsets = [6, 0], sizes = [1, 256], strides = [1, 1]} : vector<9x256xf32> to vector<1x256xf32>
    %91 = vector.shape_cast %90 : vector<1x256xf32> to vector<256xf32>
    %92 = vector.shape_cast %91 : vector<256xf32> to vector<1x256xf32>
    %93 = vector.broadcast %92 : vector<1x256xf32> to vector<4x256xf32>
    %94 = arith.mulf %89, %93 : vector<4x256xf32>
    %c240_i32_16 = arith.constant 240 : i32
    %95 = tpu.dynamic_rotate %57 by %c240_i32_16 dim 1 : vector<4x256xf32>, i32 -> vector<4x256xf32>
    %96 = vector.extract_strided_slice %2 {offsets = [7, 0], sizes = [1, 256], strides = [1, 1]} : vector<9x256xf32> to vector<1x256xf32>
    %97 = vector.shape_cast %96 : vector<1x256xf32> to vector<256xf32>
    %98 = vector.shape_cast %97 : vector<256xf32> to vector<1x256xf32>
    %99 = vector.broadcast %98 : vector<1x256xf32> to vector<4x256xf32>
    %100 = arith.mulf %95, %99 : vector<4x256xf32>
    %c239_i32_17 = arith.constant 239 : i32
    %101 = tpu.dynamic_rotate %57 by %c239_i32_17 dim 1 : vector<4x256xf32>, i32 -> vector<4x256xf32>
    %102 = vector.extract_strided_slice %2 {offsets = [8, 0], sizes = [1, 256], strides = [1, 1]} : vector<9x256xf32> to vector<1x256xf32>
    %103 = vector.shape_cast %102 : vector<1x256xf32> to vector<256xf32>
    %104 = vector.shape_cast %103 : vector<256xf32> to vector<1x256xf32>
    %105 = vector.broadcast %104 : vector<1x256xf32> to vector<4x256xf32>
    %106 = arith.mulf %101, %105 : vector<4x256xf32>
    %107 = tpu.concatenate %64, %70, %76, %82, %57, %88, %94, %100, %106, %3 in 0 : vector<4x256xf32>, vector<4x256xf32>, vector<4x256xf32>, vector<4x256xf32>, vector<4x256xf32>, vector<4x256xf32>, vector<4x256xf32>, vector<4x256xf32>, vector<4x256xf32>, vector<1x256xf32> -> vector<37x256xf32>
    %cst_18 = arith.constant dense<0.000000e+00> : vector<3x256xf32>
    %108 = tpu.matmul %58, %107, %cst_18 {dimension_numbers = #tpu.dot_dimension_numbers<[1], [0], [0], [1], [0, 0, 1, 1], [], []>} : vector<3x37xf32>, vector<37x256xf32>, vector<3x256xf32> -> vector<3x256xf32>
    %c0_19 = arith.constant 0 : index
    %c0_20 = arith.constant 0 : index
    %c0_21 = arith.constant 0 : index
    %109 = vector.load %arg5[%c0_19, %c0_20, %c0_21] : memref<1x3x256xf32, #tpu.memory_space<vmem>>, vector<1x3x256xf32>
    %110 = vector.shape_cast %109 : vector<1x3x256xf32> to vector<3x256xf32>
    %111 = vector.shape_cast %108 : vector<3x256xf32> to vector<1x3x256xf32>
    tpu.vector_store %arg5[%c0_19, %c0_20, %c0_21], %111 {strides = array<i32>} : memref<1x3x256xf32, #tpu.memory_space<vmem>>, vector<1x3x256xf32>,
    return
  }
  func.func @transform_0(%arg0: i32) -> (i32, i32, i32) {
    %c0_i32 = arith.constant 0 : i32
    %c0_i32_0 = arith.constant 0 : i32
    %c0_i32_1 = arith.constant 0 : i32
    return %arg0, %c0_i32, %c0_i32_0 : i32, i32, i32
  }
  func.func @transform_1(%arg0: i32) -> (i32, i32) {
    %c0_i32 = arith.constant 0 : i32
    %c0_i32_0 = arith.constant 0 : i32
    %c0_i32_1 = arith.constant 0 : i32
    return %c0_i32, %c0_i32_0 : i32, i32
  }
  func.func @transform_2(%arg0: i32) -> (i32, i32) {
    %c0_i32 = arith.constant 0 : i32
    %c0_i32_0 = arith.constant 0 : i32
    %c0_i32_1 = arith.constant 0 : i32
    return %c0_i32, %c0_i32_0 : i32, i32
  }
  func.func @transform_3(%arg0: i32) -> (i32, i32) {
    %c0_i32 = arith.constant 0 : i32
    %c0_i32_0 = arith.constant 0 : i32
    %c0_i32_1 = arith.constant 0 : i32
    return %c0_i32, %c0_i32_0 : i32, i32
  }
  func.func @transform_4(%arg0: i32) -> (i32, i32, i32) {
    %c0_i32 = arith.constant 0 : i32
    %c0_i32_0 = arith.constant 0 : i32
    %c0_i32_1 = arith.constant 0 : i32
    return %arg0, %c0_i32, %c0_i32_0 : i32, i32, i32
  }
}

</mosaic_0001>

<bundles_post_ra>
// kernel: tpu_custom_call.1
= control target key start
LH: loop header
LB: loop body
LE: loop exit
PB: predicated region body
PF: predicated region fallthrough
CT: control target
= control target key end

     0   :  { %9 = vsyncpa [#allocation3], 0  ;;  %s1414_s0 = inlined_call_operand.hbm [shape: f32[2,4,256], index: 0, kind: input, shape index: {}]   ;;  %s1415_s1 = inlined_call_operand.hbm [shape: f32[9,256], index: 1, kind: input, shape index: {}]   ;;  %s1416_s2 = inlined_call_operand.vmem [shape: f32[4,37], index: 2, kind: input, shape index: {}]   ;;  %s1417_s3 = inlined_call_operand.vmem [shape: f32[3,37], index: 3, kind: input, shape index: {}]   ;;  %s1418_s4 = inlined_call_operand.vmem [shape: f32[2,3,256], index: 4, kind: output, shape index: {}]  }
   0x1   :  { %11 = vsyncpa [#allocation3 + $0x1], 0 }
   0x2   :  { %12 = vsyncpa [#allocation5], 0  ;;  %s998_s15 = smov 0   ;;  %s1000_s16 = smov 0  }
   0x3   :  { %s1002_s17 = smov 0   ;;  %s1004_s18 = smov 0  }
   0x4 LB: > { %s1017_s19 = sadd.s32 4294967295, %s958_s18   ;;  %p38_p0 = scmp.ne.s32.totalorder %s950_s16, %s946_s15  ;;  %s958_s18 = sphi %s1004_s18, %s1433_s18   ;;  %s954_s17 = sphi %s1002_s17, %s1432_s17   ;;  %s950_s16 = sphi %s1000_s16, %s1431_s16   ;;  %s946_s15 = sphi %s998_s15, %s1430_s15  }
   0x5   : > { %p1419_p1 = scmp.eq.s32.totalorder %s1017_s19, 0  ;;  %p761_p2 = scmp.ge.s32.totalorder %s958_s18, 1 }
   0x6   : > { %p138_p3 = scmp.lt.s32.totalorder %s958_s18, 3  ;;  %s960_s22 = smov [#allocation4]  }
   0x7   : > { %p1025_p4 = por %p1419_p1, %p38_p0  ;;  %s150_s23 = sshll.u32 %s960_s22, 4  ;;  %s151_s23 = int_to_ptr.vmem [resolvable:$true] %s150_s23 }
   0x8   : > { %p1029_p5 = pnand %p761_p2, %p138_p3  ;;  %s1042_s25 = sadd.s32 1, %s958_s18  }
   0x9   : > { %s1422_s20 = scalar_select %p1025_p4, 1, 0 }
   0xa   : > { %s1423_s21 = scalar_select %p1029_p5, 1, 0 }
   0xb   : > { %p806_p6 = pneg %p1029_p5  ;;  %s25_s26 = sadd.s32 1, %s954_s17 }
   0xc   : > { %s22_s27 = ssub.s32 %s958_s18, %s1042_s25  ;;  %s862_s30 = scalar_lea.hbm %s1415_s1, 512 }
   0xd   : > { %p1037_p7 = pnand %p806_p6, %p1419_p1  ;;  %p863_p8 = scmp.ne.s32.totalorder %s1415_s1, %s862_s30 }
   0xe   : > { %p869_p12 = scmp.lt.u32.totalorder %s862_s30, %s1415_s1 }
   0xf   : > { %p864_p9 = pneg %p1037_p7 }
  0x11   : > { %p865_p10 = pnand %p864_p9, %p863_p8 }
  0x13   : > { %p866_p11 = pneg %p865_p10 }
  0x15   : > { %p871_p13 = pnand %p869_p12, %p866_p11 }
  0x17   : > { %874 = shalt.err (!%p871_p13)
}
  0x18   : > { %s875_s9 = scalar_lea.vmem %s151_s23, 512  ;;  %p883_p6 = scmp.lt.s32.totalorder %s151_s23, %s151_s23 }
  0x19   : > { %p876_p0 = scmp.ne.s32.totalorder %s151_s23, %s875_s9  ;;  %p884_p1 = scmp.lt.s32.totalorder %s875_s9, %s875_s9 }
  0x1b   : > { %p878_p2 = pnand %p876_p0, %p864_p9  ;;  %p885_p4 = por %p884_p1, %p883_p6 }
  0x1d   : > { %p879_p3 = pneg %p878_p2 }
  0x1f   : > { %p886_p5 = pnand %p885_p4, %p879_p3 }
  0x21   : > { %889 = shalt.err (!%p886_p5)
}
  0x22   : > { %s961_s10 = smov 256   ;;  %s962_s11 = smov 16  }
  0x23   : > { %809 = dma.hbm_to_vmem [thread:$0]  (!%p1037_p7), %s1415_s1, 512, %s151_s23, [#allocation5], %s961_s10, %s961_s10, %s962_s11  }
  0x24   : > { %p23_p8 = scmp.eq.s32.totalorder %s22_s27, 0  ;;  %p32_p9 = scmp.ne.s32.totalorder %s954_s17, %s950_s16 }
  0x25   : > { %p33_p1 = scmp.eq.s32.totalorder %s958_s18, 0  ;;  %p815_p4 = scmp.lt.s32.totalorder %s958_s18, 2 }
  0x26   : > { %s1068_s14 = scalar_select %p23_p8, %s954_s17, %s25_s26  }
  0x27   : > { %p34_p5 = por %p33_p1, %p32_p9  ;;  %s170_s15 = sand.u32 1, %s954_s17  }
  0x28   : > { %s764_s22 = sshll.u32 %s170_s15, 3  ;;  %s782_s28 = sshll.u32 %s958_s18, 7 }
  0x29   : > { %s1075_s5 = scalar_lea.hbm %s1414_s0, %s782_s28  ;;  %s174_s23 = scalar_lea.vmem [#allocation2], %s764_s22 }
  0x2a   : > { %s182_s24 = sshll.u32 %s174_s23, 4  ;;  %p1079_p7 = pnand %p815_p4, %p34_p5  ;;  %s1077_s24 = int_to_ptr.vmem [resolvable:$true] %s182_s24 }
  0x2b   : > { %s171_s18 = scalar_lea.sflag [#allocation3], %s170_s15  ;;  %s890_s27 = scalar_lea.hbm %s1075_s5, 128 }
  0x2c   : > { %p891_p10 = scmp.ne.s32.totalorder %s1075_s5, %s890_s27  ;;  %p892_p11 = pneg %p1079_p7 }
  0x2d   : > { %s895_s8 = scalar_lea.hbm %s1414_s0, 256  ;;  %p896_p0 = scmp.lt.u32.totalorder %s1075_s5, %s1414_s0 }
  0x2e   : > { %p893_p12 = pnand %p892_p11, %p891_p10  ;;  %p897_p2 = scmp.lt.u32.totalorder %s895_s8, %s890_s27 }
  0x2f   : > { %p899_p6 = scmp.lt.u32.totalorder %s890_s27, %s1075_s5 }
  0x30   : > { %p894_p13 = pneg %p893_p12  ;;  %p898_p3 = por %p897_p2, %p896_p0 }
  0x32   : > { %p900_p8 = por %p899_p6, %p898_p3 }
  0x34   : > { %p901_p9 = pnand %p900_p8, %p894_p13 }
  0x36   : > { %904 = shalt.err (!%p901_p9)
}
  0x37   : > { %s905_s11 = scalar_lea.vmem %s1077_s24, 128  ;;  %s963_s12 = smov [#allocation2]  }
  0x38   : > { %p906_p1 = scmp.ne.s32.totalorder %s1077_s24, %s905_s11  ;;  %s910_s13 = sshll.u32 %s963_s12, 4  ;;  %s911_s13 = int_to_ptr.vmem [resolvable:$false] %s910_s13 }
  0x39   : > { %s912_s15 = scalar_lea.vmem %s911_s13, 256  ;;  %p913_p10 = scmp.lt.s32.totalorder %s1077_s24, %s911_s13 }
  0x3a   : > { %p908_p4 = pnand %p906_p1, %p892_p11  ;;  %p914_p12 = scmp.lt.s32.totalorder %s912_s15, %s905_s11 }
  0x3c   : > { %p909_p5 = pneg %p908_p4  ;;  %p915_p0 = por %p914_p12, %p913_p10 }
  0x3e   : > { %p916_p2 = pnand %p915_p0, %p909_p5 }
  0x40   : > { %919 = shalt.err (!%p916_p2)
}
  0x41   : > { %813 = dma.hbm_to_vmem [thread:$0]  (!%p1079_p7), %s1075_s5, 128, %s1077_s24, %s171_s18  }
  0x42   : > { %p1426_p13 = scmp.ne.s32.totalorder %s1423_s21, 0 }
  0x43   : > { %s193_s22 = sand.u32 (!%p1426_p13), 1, %s950_s16   ;;  %p1427_p11 = scmp.ne.s32.totalorder (!%p1426_p13), %s1422_s20, 0 }
  0x44   : > { %191 = sbr.rel (%p1426_p13) target bundleno = 815 (0x32f), region = 36  ;;  %s768_s28 = sshll.u32 (!%p1426_p13), %s193_s22, 3 }
  0x45   : > { %s194_s29 = scalar_lea.sflag (!%p1426_p13), [#allocation3], %s193_s22  ;;  %s197_s30 = scalar_lea.vmem (!%p1426_p13), [#allocation2], %s768_s28 }
  0x4b   : > { %937 = dma.done.wait (%p1427_p11), %s194_s29, 128  }
  0x4c   : > { %939 = vsyncadd (%p1427_p11), %s194_s29, 4294967168  ;;  %p1428_p3 = scmp.eq.s32.totalorder %s1017_s19, 0 }
  0x4e   : > { %941 = dma.done.wait (%p1428_p3), [#allocation5], 512   ;;  %p1429_p6 = pmov %p1428_p3 }
  0x4f   : > { %v1119_v0 = vld [vmem:[%s197_s30] sm:$0xff]  ;;  %s964_s21 = smov 1   ;;  %s965_s5 = smov 16   ;;  %v970_v2 = vmov 0.0   ;;  %v244_v3 = vlaneseq  ;;  %v1162_v9 = vld [vmem:[#allocation4] sm:$0xff]  ;;  %v1164_v10 = vld [vmem:[#allocation4 + $0x8] sm:$0xff] }
  0x50   : > { %943 = vsyncadd (%p1429_p6), [#allocation5], 4294966784  ;;  %293 = vrot.lane.b32.xlu1 %v1119_v0, %s964_s21  ;;  %259 = vrot.lane.b32.xlu0 %v1119_v0, %s965_s5  ;;  %v1127_v1 = vcombine.high %v1119_v0, %v1119_v0  ;;  %s966_s20 = smov 17   ;;  %s967_s23 = smov 15   ;;  %vm402_vm4 = vcmask 1043456   ;;  %vm417_vm9 = vcmask 1044480  }
  0x51   : > { %s968_s24 = smov 127   ;;  %s969_s26 = smov 112   ;;  %488 = vmatprep.mubr.f32.mxu0 %v970_v2  ;;  %671 = vmatprep.mubr.f32.mxu1 %v970_v2  ;;  %v1157_v4 = vshrl.u32 %v244_v3, 7  ;;  %v1159_v5 = vand.u32 127, %v244_v3  ;;  %vm413_vm10 = vcmask 302080  }
  0x52   : > { %s971_s18 = smov 113   ;;  %s972_s27 = smov 111  }
  0x53   : > { %v302_v8 = vsub.s32 3, %v1157_v4  ;;  %v268_v11 = vsub.s32 1, %v1157_v4  ;;  %vm297_vm0 = vcmp.lt.s32.totalorder %v1159_v5, 1  ;;  %v251_v14 = vsub.s32 0, %v1157_v4  ;;  %p226_p7 = scmp.lt.s32.totalorder %s1017_s19, 1 }
  0x54   : > { %240 = vrot.lane.b32.xlu0 %v1119_v0, %s966_s20  ;;  %295 = vrot.lane.b32.xlu1 %v1127_v1, %s964_s21  ;;  %vm263_vm1 = vcmp.lt.s32.totalorder %v1159_v5, 16  ;;  %v285_v17 = vsub.s32 2, %v1157_v4  ;;  %vm246_vm2 = vcmp.lt.s32.totalorder %v1159_v5, 17  ;;  %vm280_vm3 = vcmp.lt.s32.totalorder %v1159_v5, 15 }
  0x55   : > { %v1170_v15 = vrot.slane %v1162_v9, %v302_v8  ;;  %v1173_v16 = vrot.slane %v1164_v10, %v302_v8  ;;  %v1182_v20 = vrot.slane %v1162_v9, %v268_v11  ;;  %v1185_v21 = vrot.slane %v1164_v10, %v268_v11  ;;  %s1435_s19 = smov (!%p226_p7, %s1017_s19), 1 }
  0x56   : > { %v1189_v22 = vrot.slane %v1162_v9, %v251_v14  ;;  %v1192_v23 = vrot.slane %v1164_v10, %v251_v14  ;;  %v1204_v32 = vrot.slane %v1162_v9, %v285_v17  ;;  %v1207_v33 = vrot.slane %v1164_v10, %v285_v17  ;;  %s783_s10 = sshll.u32 %s1435_s19, 3 }
  0x57   : > { %v319_v36 = vsub.s32 5, %v1157_v4  ;;  %vm314_vm5 = vcmp.lt.s32.totalorder %v1159_v5, 127  ;;  %v353_v41 = vsub.s32 7, %v1157_v4  ;;  %vm348_vm6 = vcmp.lt.s32.totalorder %v1159_v5, 112  ;;  %s230_s13 = scalar_lea.vmem %s1418_s4, %s783_s10 }
  0x58   : > { %242 = vrot.lane.b32.xlu1 %v1127_v1, %s966_s20  ;;  %261 = vrot.lane.b32.xlu0 %v1127_v1, %s965_s5  ;;  %v336_v2 = vsub.s32 6, %v1157_v4  ;;  %vm331_vm7 = vcmp.lt.s32.totalorder %v1159_v5, 113  ;;  %vm365_vm8 = vcmp.lt.s32.totalorder %v1159_v5, 111 }
  0x59   : > { %v1225_v50 = vrot.slane %v1162_v9, %v319_v36  ;;  %v1228_v51 = vrot.slane %v1164_v10, %v319_v36  ;;  %v1240_v62 = vrot.slane %v1162_v9, %v353_v41  ;;  %v1243_v63 = vrot.slane %v1164_v10, %v353_v41 }
  0x5a   : > { %v1256_v14 = vrot.slane %v1162_v9, %v336_v2  ;;  %v1259_v17 = vrot.slane %v1164_v10, %v336_v2  ;;  %v1268_v10 = vld [vmem:[#allocation4 + $0x10] ss:$0 sm:$0xff] }
  0x5c   : > { %278 = vrot.lane.b32.xlu1 %v1127_v1, %s967_s23  ;;  %276 = vrot.lane.b32.xlu0 %v1119_v0, %s967_s23 }
  0x60   : > { %312 = vrot.lane.b32.xlu1 %v1127_v1, %s968_s24  ;;  %310 = vrot.lane.b32.xlu0 %v1119_v0, %s968_s24 }
  0x64   : > { %346 = vrot.lane.b32.xlu1 %v1127_v1, %s969_s26  ;;  %344 = vrot.lane.b32.xlu0 %v1119_v0, %s969_s26 }
  0x68   : > { %329 = vrot.lane.b32.xlu1 %v1127_v1, %s971_s18  ;;  %327 = vrot.lane.b32.xlu0 %v1119_v0, %s971_s18 }
  0x6c   : > { %363 = vrot.lane.b32.xlu1 %v1127_v1, %s972_s27  ;;  %361 = vrot.lane.b32.xlu0 %v1119_v0, %s972_s27 }
  0xc2   : > { %v294_v6 = vpop.permute.xlu1 %293  ;;  %v260_v7 = vpop.permute.xlu0 %259 }
  0xc6   : > { %v241_v12 = vpop.permute.xlu0 %240  ;;  %v296_v13 = vpop.permute.xlu1 %295 }
  0xc7   : > { %v298_v18 = vsel %vm297_vm0, %v294_v6, %v296_v13  ;;  %v299_v19 = vsel %vm297_vm0, %v296_v13, %v294_v6 }
  0xc8   : > { %v308_v26 = vmul.f32 %v1170_v15, %v299_v19  ;;  %v309_v27 = vmul.f32 %v1173_v16, %v298_v18 }
  0xca   : > { %v243_v24 = vpop.permute.xlu1 %242  ;;  %v262_v25 = vpop.permute.xlu0 %261  ;;  %v386_v42 = vrot.slane %v308_v26, 4  ;;  %v387_v43 = vrot.slane %v309_v27, 4 }
  0xcb   : > { %v264_v28 = vsel %vm263_vm1, %v260_v7, %v262_v25  ;;  %v265_v29 = vsel %vm263_vm1, %v262_v25, %v260_v7  ;;  %v247_v34 = vsel %vm246_vm2, %v241_v12, %v243_v24  ;;  %v248_v35 = vsel %vm246_vm2, %v243_v24, %v241_v12 }
  0xcc   : > { %v274_v30 = vmul.f32 %v1182_v20, %v265_v29  ;;  %v275_v31 = vmul.f32 %v1185_v21, %v264_v28  ;;  %v257_v46 = vmul.f32 %v1189_v22, %v248_v35  ;;  %v258_v47 = vmul.f32 %v1192_v23, %v247_v34 }
  0xce   : > { %v380_v37 = vrot.slane %v274_v30, 4  ;;  %v381_v38 = vrot.slane %v275_v31, 4  ;;  %v279_v39 = vpop.permute.xlu1 %278  ;;  %v277_v40 = vpop.permute.xlu0 %276  ;;  %v1270_v31 = vld [vmem:[#allocation4 + $0x18] ss:$0 sm:$0xff] }
  0xcf   : > { %v281_v44 = vsel %vm280_vm3, %v277_v40, %v279_v39  ;;  %v282_v45 = vsel %vm280_vm3, %v279_v39, %v277_v40 }
  0xd0   : > { %v291_v48 = vmul.f32 %v1204_v32, %v282_v45  ;;  %v292_v49 = vmul.f32 %v1207_v33, %v281_v44  ;;  %v404_v54 = vsel %vm402_vm4, %v258_v47, %v381_v38  ;;  %v403_v56 = vsel %vm402_vm4, %v257_v46, %v380_v37 }
  0xd2   : > { %v313_v52 = vpop.permute.xlu1 %312  ;;  %v311_v53 = vpop.permute.xlu0 %310  ;;  %v406_v55 = vsel %vm402_vm4, %v292_v49, %v387_v43  ;;  %v405_v57 = vsel %vm402_vm4, %v291_v48, %v386_v42  ;;  %v236_v48 = vld [vmem:[%s1416_s2] sm:$0xf] }
  0xd3   : > { %v315_v58 = vsel %vm314_vm5, %v311_v53, %v313_v52  ;;  %v316_v59 = vsel %vm314_vm5, %v313_v52, %v311_v53  ;;  %v784_v60 = vpack.c.bf16 %v406_v55, %v404_v54  ;;  %v786_v61 = vpack.c.bf16 %v405_v57, %v403_v56 }
  0xd4   : > { %v325_v3 = vmul.f32 %v1225_v50, %v315_v58  ;;  %v326_v6 = vmul.f32 %v1228_v51, %v316_v59 }
  0xd5   : > { %785 = vmatprep.subr.bf16.mxu0 %v784_v60 }
  0xd6   : > { %v347_v7 = vpop.permute.xlu1 %346  ;;  %787 = vmatpush1.bf16.msra.mxu0 %v786_v61  ;;  %v345_v8 = vpop.permute.xlu0 %344  ;;  %v392_v18 = vrot.slane %v325_v3, 4  ;;  %v393_v19 = vrot.slane %v326_v6, 4 }
  0xd7   : > { %v349_v11 = vsel %vm348_vm6, %v345_v8, %v347_v7  ;;  %v350_v12 = vsel %vm348_vm6, %v347_v7, %v345_v8 }
  0xd8   : > { %v359_v13 = vmul.f32 %v1240_v62, %v349_v11  ;;  %v360_v4 = vmul.f32 %v1243_v63, %v350_v12  ;;  %v408_v36 = vsel %vm402_vm4, %v1127_v1, %v393_v19  ;;  %v407_v38 = vsel %vm402_vm4, %v1119_v0, %v392_v18 }
  0xda   : > { %v330_v24 = vpop.permute.xlu1 %329  ;;  %v328_v25 = vpop.permute.xlu0 %327  ;;  %v398_v28 = vrot.slane %v359_v13, 4  ;;  %v399_v29 = vrot.slane %v360_v4, 4 }
  0xdb   : > { %v332_v26 = vsel %vm331_vm7, %v328_v25, %v330_v24  ;;  %v333_v27 = vsel %vm331_vm7, %v330_v24, %v328_v25 }
  0xdc   : > { %v342_v9 = vmul.f32 %v1256_v14, %v332_v26  ;;  %v343_v30 = vmul.f32 %v1259_v17, %v333_v27 }
  0xde   : > { %v364_v34 = vpop.permute.xlu1 %363  ;;  %v362_v35 = vpop.permute.xlu0 %361  ;;  %v410_v37 = vsel %vm402_vm4, %v343_v30, %v399_v29  ;;  %v409_v39 = vsel %vm402_vm4, %v342_v9, %v398_v28 }
  0xdf   : > { %v366_v40 = vsel %vm365_vm8, %v362_v35, %v364_v34  ;;  %v367_v41 = vsel %vm365_vm8, %v364_v34, %v362_v35  ;;  %v788_v42 = vpack.c.bf16 %v410_v37, %v408_v36  ;;  %v790_v43 = vpack.c.bf16 %v409_v39, %v407_v38 }
  0xe0   : > { %v376_v44 = vmul.f32 %v1268_v10, %v366_v40  ;;  %v377_v45 = vmul.f32 %v1270_v31, %v367_v41 }
  0xe1   : > { %789 = vmatprep.subr.bf16.mxu0 %v788_v42 }
  0xe2   : > { %791 = vmatpush1.bf16.msra.mxu0 %v790_v43  ;;  %v412_v46 = vsel %vm402_vm4, %v377_v45, 1.0  ;;  %v411_v47 = vsel %vm402_vm4, %v376_v44, 1.0 }
  0xe3   : > { %774 = vmatprep.subr.msk.mxu0 %vm417_vm9, %v412_v46 }
  0xe6   : > { %775 = vmatpush1.msk.msra.mxu0 %vm417_vm9, %v411_v47 }
  0xe7   : > { %776 = vmatmul.mubr.msk.f32.vlgmr.msra.gmra.mrb[0].mxu0 %vm413_vm10, %v236_v48 }
 0x1ba   : > { %v490_v49 = vpop.f32.mrb[0].mxu0 }
 0x1bb   : > { %v495_v52 = vmax.f32 %v490_v49, 0.0  ;;  %v492_v53 = vpop.f32.mrb[1].mxu0 }
 0x1bc   : > { %v496_v54 = vmax.f32 %v492_v53, 0.0 }
 0x1bd   : > { %v1293_v55 = vadd.f32 %v495_v52, %v1119_v0 }
 0x1be   : > { %v1296_v56 = vadd.f32 %v496_v54, %v1127_v1 }
 0x1bf   : > { %508 = vrot.lane.b32.xlu0 %v1293_v55, %s965_s5 }
 0x1c0   : > { %510 = vrot.lane.b32.xlu1 %v1296_v56, %s965_s5 }
 0x1c3   : > { %524 = vrot.lane.b32.xlu0 %v1293_v55, %s964_s21 }
 0x1c4   : > { %526 = vrot.lane.b32.xlu1 %v1296_v56, %s964_s21 }
 0x1c7   : > { %500 = vrot.lane.b32.xlu0 %v1293_v55, %s966_s20 }
 0x1c8   : > { %502 = vrot.lane.b32.xlu1 %v1296_v56, %s966_s20 }
 0x1cb   : > { %516 = vrot.lane.b32.xlu0 %v1293_v55, %s967_s23 }
 0x1cc   : > { %518 = vrot.lane.b32.xlu1 %v1296_v56, %s967_s23 }
 0x1cf   : > { %532 = vrot.lane.b32.xlu0 %v1293_v55, %s968_s24 }
 0x1d0   : > { %534 = vrot.lane.b32.xlu1 %v1296_v56, %s968_s24 }
 0x1d3   : > { %548 = vrot.lane.b32.xlu0 %v1293_v55, %s969_s26 }
 0x1d4   : > { %550 = vrot.lane.b32.xlu1 %v1296_v56, %s969_s26 }
 0x1d7   : > { %540 = vrot.lane.b32.xlu0 %v1293_v55, %s971_s18 }
 0x1d8   : > { %542 = vrot.lane.b32.xlu1 %v1296_v56, %s971_s18 }
 0x1db   : > { %556 = vrot.lane.b32.xlu0 %v1293_v55, %s972_s27 }
 0x1dc   : > { %558 = vrot.lane.b32.xlu1 %v1296_v56, %s972_s27 }
 0x231   : > { %v509_v0 = vpop.permute.xlu0 %508 }
 0x232   : > { %v511_v1 = vpop.permute.xlu1 %510 }
 0x233   : > { %v512_v59 = vsel %vm263_vm1, %v509_v0, %v511_v1  ;;  %v513_v60 = vsel %vm263_vm1, %v511_v1, %v509_v0 }
 0x234   : > { %v514_v7 = vmul.f32 %v513_v60, %v1182_v20  ;;  %v515_v8 = vmul.f32 %v512_v59, %v1185_v21 }
 0x235   : > { %v525_v57 = vpop.permute.xlu0 %524 }
 0x236   : > { %v527_v58 = vpop.permute.xlu1 %526  ;;  %v566_v26 = vrot.slane %v514_v7, 4  ;;  %v567_v20 = vrot.slane %v515_v8, 4 }
 0x237   : > { %v528_v61 = vsel %vm297_vm0, %v525_v57, %v527_v58  ;;  %v529_v2 = vsel %vm297_vm0, %v527_v58, %v525_v57 }
 0x238   : > { %v530_v13 = vmul.f32 %v529_v2, %v1170_v15  ;;  %v531_v4 = vmul.f32 %v528_v61, %v1173_v16 }
 0x239   : > { %v501_v3 = vpop.permute.xlu0 %500 }
 0x23a   : > { %v503_v6 = vpop.permute.xlu1 %502  ;;  %v572_v28 = vrot.slane %v530_v13, 4  ;;  %v573_v29 = vrot.slane %v531_v4, 4 }
 0x23b   : > { %v504_v11 = vsel %vm246_vm2, %v501_v3, %v503_v6  ;;  %v505_v12 = vsel %vm246_vm2, %v503_v6, %v501_v3  ;;  %v499_v3 = vld [vmem:[%s1417_s3] sm:$0x7] }
 0x23c   : > { %v506_v19 = vmul.f32 %v505_v12, %v1189_v22  ;;  %v507_v24 = vmul.f32 %v504_v11, %v1192_v23 }
 0x23d   : > { %v517_v18 = vpop.permute.xlu0 %516 }
 0x23e   : > { %v519_v25 = vpop.permute.xlu1 %518  ;;  %v589_v22 = vsel %vm402_vm4, %v507_v24, %v567_v20  ;;  %v588_v34 = vsel %vm402_vm4, %v506_v19, %v566_v26 }
 0x23f   : > { %v520_v21 = vsel %vm280_vm3, %v517_v18, %v519_v25  ;;  %v521_v27 = vsel %vm280_vm3, %v519_v25, %v517_v18 }
 0x240   : > { %v522_v15 = vmul.f32 %v521_v27, %v1204_v32  ;;  %v523_v16 = vmul.f32 %v520_v21, %v1207_v33 }
 0x241   : > { %v533_v9 = vpop.permute.xlu0 %532 }
 0x242   : > { %v535_v30 = vpop.permute.xlu1 %534  ;;  %v591_v23 = vsel %vm402_vm4, %v523_v16, %v573_v29  ;;  %v590_v35 = vsel %vm402_vm4, %v522_v15, %v572_v28 }
 0x243   : > { %v536_v36 = vsel %vm314_vm5, %v533_v9, %v535_v30  ;;  %v537_v37 = vsel %vm314_vm5, %v535_v30, %v533_v9  ;;  %v792_v38 = vpack.c.bf16 %v591_v23, %v589_v22  ;;  %v794_v32 = vpack.c.bf16 %v590_v35, %v588_v34 }
 0x244   : > { %v538_v33 = vmul.f32 %v536_v36, %v1225_v50  ;;  %v539_v40 = vmul.f32 %v537_v37, %v1228_v51 }
 0x245   : > { %v549_v39 = vpop.permute.xlu0 %548  ;;  %793 = vmatprep.subr.bf16.mxu1 %v792_v38 }
 0x246   : > { %795 = vmatpush1.bf16.msra.mxu1 %v794_v32  ;;  %v551_v41 = vpop.permute.xlu1 %550  ;;  %v578_v47 = vrot.slane %v538_v33, 4  ;;  %v579_v48 = vrot.slane %v539_v40, 4 }
 0x247   : > { %v552_v42 = vsel %vm348_vm6, %v549_v39, %v551_v41  ;;  %v553_v43 = vsel %vm348_vm6, %v551_v41, %v549_v39 }
 0x248   : > { %v554_v44 = vmul.f32 %v552_v42, %v1240_v62  ;;  %v555_v45 = vmul.f32 %v553_v43, %v1243_v63  ;;  %v593_v63 = vsel %vm402_vm4, %v1296_v56, %v579_v48  ;;  %v592_v58 = vsel %vm402_vm4, %v1293_v55, %v578_v47 }
 0x249   : > { %v541_v46 = vpop.permute.xlu0 %540 }
 0x24a   : > { %v543_v49 = vpop.permute.xlu1 %542  ;;  %v584_v52 = vrot.slane %v554_v44, 4  ;;  %v585_v53 = vrot.slane %v555_v45, 4 }
 0x24b   : > { %v544_v50 = vsel %vm331_vm7, %v541_v46, %v543_v49  ;;  %v545_v51 = vsel %vm331_vm7, %v543_v49, %v541_v46 }
 0x24c   : > { %v546_v54 = vmul.f32 %v544_v50, %v1256_v14  ;;  %v547_v0 = vmul.f32 %v545_v51, %v1259_v17 }
 0x24d   : > { %v557_v1 = vpop.permute.xlu0 %556 }
 0x24e   : > { %v559_v62 = vpop.permute.xlu1 %558  ;;  %v595_v57 = vsel %vm402_vm4, %v547_v0, %v585_v53  ;;  %v594_v59 = vsel %vm402_vm4, %v546_v54, %v584_v52 }
 0x24f   : > { %v560_v60 = vsel %vm365_vm8, %v557_v1, %v559_v62  ;;  %v561_v14 = vsel %vm365_vm8, %v559_v62, %v557_v1  ;;  %v796_v17 = vpack.c.bf16 %v595_v57, %v593_v63  ;;  %v798_v61 = vpack.c.bf16 %v594_v59, %v592_v58 }
 0x250   : > { %v563_v2 = vmul.f32 %v1270_v31, %v561_v14  ;;  %v562_v56 = vmul.f32 %v1268_v10, %v560_v60 }
 0x251   : > { %797 = vmatprep.subr.bf16.mxu1 %v796_v17 }
 0x252   : > { %799 = vmatpush1.bf16.msra.mxu1 %v798_v61  ;;  %v597_v55 = vsel %vm402_vm4, %v563_v2, 1.0  ;;  %v596_v6 = vsel %vm402_vm4, %v562_v56, 1.0 }
 0x253   : > { %777 = vmatprep.subr.msk.mxu1 %vm417_vm9, %v597_v55 }
 0x256   : > { %778 = vmatpush1.msk.msra.mxu1 %vm417_vm9, %v596_v6 }
 0x257   : > { %779 = vmatmul.mubr.msk.f32.vlgmr.msra.gmra.mrb[0].mxu1 %vm413_vm10, %v499_v3 }
 0x32a   : > { %v673_v5 = vpop.f32.mrb[0].mxu1 }
 0x32b   : > { %v675_v10 = vpop.f32.mrb[1].mxu1 }
 0x32c   : > { %v680_v31 = vcombine.low %v673_v5, %v675_v10 }
 0x32e   : > { %682 = vst [vmem:[%s230_s13] sm:$0x77] %v680_v31 }
 0x32f PF: > { %p15_p8 = scmp.ge.s32.totalorder %s1042_s25, 4   ;;  %s1430_s15 = smov %s950_s16 }
 0x330   : > { %s1431_s16 = smov %s954_s17  ;;  %s1432_s17 = smov %s1068_s14 }
 0x331   : > { %s1433_s18 = smov %s1042_s25  ;;  %17 = sbr.rel (!%p15_p8) target bundleno = 4 (0x4), region = 80 }
 0x338   :  { %704 = vsyncpa [#allocation3], 1 }
 0x339   :  { %706 = vsyncpa [#allocation3 + $0x1], 1 }
 0x33a   :  { %707 = vsyncpa [#allocation5], 1 }

</bundles_post_ra>
